<compile_context>
chip_gen: v6e
topology: v6e:2x2x1
jax: 0.10.0
libtpu: 0.0.40
codegen_flags: <defaults>
</compile_context>

<pallas_src>
import functools

import numpy as np

import jax
import jax.numpy as jnp
from jax.experimental import pallas as pl
from jax.experimental.pallas import tpu as pltpu


def _round_up(v: int, m: int) -> int:
    return (v + m - 1) // m * m


_SQRT_HALF = 0.7071067811865476
_SQRT_2_OVER_PI = 0.7978845608028654


def _ffn_layernorm_kernel(x_ref, w1_ref, b1_ref, w2_ref, b2_ref,
                          gamma_ref, beta_ref, o_ref, acc_ref,
                          *, eps, matmul_dtype, gelu_approx):
    k = pl.program_id(1)
    n_k = pl.num_programs(1)

    @pl.when(k == 0)
    def _init():
        acc_ref[...] = jnp.zeros_like(acc_ref)

    # Token tile (tile_m, d_model) in its native dtype; the matmul operands are
    # cast to matmul_dtype (bf16 in production), the residual keeps native x.
    x = x_ref[...]

    # Linear 1 chunk (d_model -> tile_k) on the MXU, f32 accumulation.
    h = jnp.dot(x.astype(matmul_dtype), w1_ref[...],
                preferred_element_type=jnp.float32)
    h = h + b1_ref[...]                                     # (1, tile_k) f32 bias

    if gelu_approx:
        # tanh approximation: transcendental lands on the EUP (separate slot).
        h = 0.5 * h * (1.0 + jnp.tanh(
            jnp.float32(_SQRT_2_OVER_PI)
            * (h + jnp.float32(0.044715) * h * h * h)))
    else:
        # Exact erf GELU (torch.nn.GELU() default).
        h = 0.5 * h * (1.0 + jax.lax.erf(h * jnp.float32(_SQRT_HALF)))

    # Linear 2 chunk (tile_k -> d_model) on the MXU, accumulate into f32 scratch.
    acc_ref[...] += jnp.dot(h.astype(w2_ref.dtype), w2_ref[...],
                            preferred_element_type=jnp.float32)

    @pl.when(k == n_k - 1)
    def _finalize():
        core = acc_ref[...] + b2_ref[...]                   # (tile_m, d_model) f32
        y = x.astype(jnp.float32) + core                    # residual in f32
        mean = jnp.mean(y, axis=-1, keepdims=True)
        cen = y - mean
        var = jnp.mean(cen * cen, axis=-1, keepdims=True)
        norm = cen * jax.lax.rsqrt(var + jnp.float32(eps))
        o_ref[...] = (norm * gamma_ref[...] + beta_ref[...]).astype(o_ref.dtype)


def positionwise_ffn(x, w1, b1, w2, b2, gamma, beta, *, eps=1e-5,
                     matmul_dtype=jnp.bfloat16, gelu_approx=False,
                     tile_m=None, tile_k=None):
    """x: (batch, seq, d_model). Weights pre-transposed to (in, out).

    Returns x's shape/dtype. matmul_dtype controls the MXU operand dtype
    (default bf16; accumulation / GELU / LayerNorm stay f32).
    """
    batch, seq, d_model = x.shape
    d_inner = w1.shape[1]
    m = batch * seq
    x2d = x.reshape(m, d_model)

    if matmul_dtype is None:
        matmul_dtype = x.dtype
    matmul_dtype = np.dtype(matmul_dtype)
    w1 = w1.astype(matmul_dtype)
    w2 = w2.astype(matmul_dtype)

    itm = np.dtype(x2d.dtype).itemsize
    itw = matmul_dtype.itemsize

    # ---- Chip-aware VMEM budget (64 MiB/TC on v7x, 128 MiB on v5e/v6e) ------
    try:
        vmem_cap = int(pltpu.get_tpu_info().vmem_capacity_bytes)
    except Exception:
        vmem_cap = 64 * 1024 * 1024
    vmem_cap = max(vmem_cap, 32 * 1024 * 1024)
    budget = int(0.80 * vmem_cap)

    # ---- d_inner chunking (W1 column blocks / W2 row blocks) ----------------
    full_w_bytes = 2 * d_model * d_inner * itw
    if tile_k is None:
        if full_w_bytes <= budget // 3:
            tile_k = d_inner                       # fully resident weights (n_k == 1)
        else:
            per_col = 2 * d_model * itw            # one W1 column + one W2 row
            tk = (budget // 3) // (2 * per_col)    # double-buffered streamed chunks
            tile_k = max(128, (tk // 128) * 128)
    tile_k = max(1, min(tile_k, d_inner))
    d_inner_pad = _round_up(d_inner, tile_k)
    if d_inner_pad != d_inner:
        # Zero-padding d_inner is exact: padded W2 rows are zero, so padded
        # hidden channels contribute nothing.
        w1 = jnp.pad(w1, ((0, 0), (0, d_inner_pad - d_inner)))
        w2 = jnp.pad(w2, ((0, d_inner_pad - d_inner), (0, 0)))
        b1 = jnp.pad(b1, ((0, d_inner_pad - d_inner),))
    n_k = d_inner_pad // tile_k

    # Parameters as f32 (1, F) rows: no per-iteration casts in the kernel body.
    b1_2d = b1.astype(jnp.float32).reshape(1, d_inner_pad)
    b2_2d = b2.astype(jnp.float32).reshape(1, d_model)
    g_2d = gamma.astype(jnp.float32).reshape(1, d_model)
    be_2d = beta.astype(jnp.float32).reshape(1, d_model)

    # ---- Token tile sized from the post-weight VMEM headroom ----------------
    if n_k == 1:
        bytes_weights = full_w_bytes + d_inner_pad * 4        # single-buffered + b1
    else:
        bytes_weights = 2 * (2 * d_model * tile_k * itw + tile_k * 4)
    bytes_params = 2 * 3 * d_model * 4
    per_row = (2 * d_model * itm            # x tile, double-buffered
               + 2 * d_model * itm          # out tile, double-buffered
               + d_model * 4                # f32 accumulator scratch
               + d_model * (8 + itw)        # LayerNorm temporaries + x cast
               + tile_k * (4 + itw))        # h in f32 + cast copy for dot 2
    per_row = int(per_row * 1.3)            # layout / spill slack

    if tile_m is None:
        headroom = max(budget - bytes_weights - bytes_params, 0)
        tile_m = 512
        while tile_m > 8 and tile_m * per_row > headroom:
            tile_m //= 2
    tile_m = _round_up(max(8, min(tile_m, _round_up(m, 8))), 8)
    m_pad = _round_up(m, tile_m)
    if m_pad != m:
        x2d = jnp.pad(x2d, ((0, m_pad - m), (0, 0)))
    n_m = m_pad // tile_m

    vmem_needed = bytes_weights + bytes_params + tile_m * per_row
    vmem_limit = min(budget, max(32 * 1024 * 1024, int(1.1 * vmem_needed)))

    # Advisory cost estimate for XLA's scheduler.
    cost = pl.CostEstimate(
        flops=4 * m_pad * d_model * d_inner_pad,
        transcendentals=(m_pad * d_inner_pad) if gelu_approx else 0,
        bytes_accessed=(2 * m_pad * d_model * itm
                        + (1 if n_k == 1 else n_m) * 2 * d_model * d_inner_pad * itw
                        + (d_inner_pad + 3 * d_model) * 4),
    )

    kernel = functools.partial(_ffn_layernorm_kernel, eps=eps,
                               matmul_dtype=matmul_dtype,
                               gelu_approx=gelu_approx)

    def _build_specs(single_buffer_consts):
        def const_spec(shape):
            if single_buffer_consts:
                return pl.BlockSpec(shape, lambda i, k: (0, 0),
                                    pipeline_mode=pl.Buffered(1))
            return pl.BlockSpec(shape, lambda i, k: (0, 0))

        if n_k == 1:
            # Fully resident weights: constant index -> single-buffered.
            w1_spec = const_spec((d_model, tile_k))
            b1_spec = const_spec((1, tile_k))
            w2_spec = const_spec((tile_k, d_model))
        else:
            # Streamed d_inner chunks: keep default double-buffering so the
            # next weight chunk DMA hides behind the MXU.
            w1_spec = pl.BlockSpec((d_model, tile_k), lambda i, k: (0, k))
            b1_spec = pl.BlockSpec((1, tile_k), lambda i, k: (0, k))
            w2_spec = pl.BlockSpec((tile_k, d_model), lambda i, k: (k, 0))

        in_specs = [
            pl.BlockSpec((tile_m, d_model), lambda i, k: (i, 0)),   # x tile
            w1_spec, b1_spec, w2_spec,
            const_spec((1, d_model)),                                # b2
            const_spec((1, d_model)),                                # gamma
            const_spec((1, d_model)),                                # beta
        ]
        out_spec = pl.BlockSpec((tile_m, d_model), lambda i, k: (i, 0))
        return in_specs, out_spec

    def _run(single_buffer_consts):
        in_specs, out_spec = _build_specs(single_buffer_consts)
        return pl.pallas_call(
            kernel,
            out_shape=jax.ShapeDtypeStruct((m_pad, d_model), x.dtype),
            grid_spec=pltpu.PrefetchScalarGridSpec(
                num_scalar_prefetch=0,
                grid=(n_m, n_k),
                in_specs=in_specs,
                out_specs=out_spec,
                scratch_shapes=[pltpu.VMEM((tile_m, d_model), jnp.float32)],
            ),
            compiler_params=pltpu.CompilerParams(
                # Token tiles shard across TCs on v7x; the d_inner chunk axis
                # carries the accumulator -> "arbitrary".
                dimension_semantics=("parallel", "arbitrary"),
                vmem_limit_bytes=vmem_limit,
            ),
            cost_estimate=cost,
        )(x2d, w1, b1_2d, w2, b2_2d, g_2d, be_2d)

    try:
        out2d = _run(True)
    except Exception:
        # Older jax without BlockSpec(pipeline_mode=...): identical kernel with
        # default double-buffered constants (correct, slightly more VMEM).
        out2d = _run(False)

    if m_pad != m:
        out2d = out2d[:m]
    return out2d.reshape(batch, seq, d_model)


def _reference(x, w1, b1, w2, b2, gamma, beta, eps=1e-5):
    h = x @ w1 + b1
    h = 0.5 * h * (1.0 + jax.lax.erf(h / jnp.sqrt(2.0)))
    core = h @ w2 + b2
    y = x + core
    mean = jnp.mean(y, axis=-1, keepdims=True)
    var = jnp.mean((y - mean) ** 2, axis=-1, keepdims=True)
    return (y - mean) / jnp.sqrt(var + eps) * gamma + beta


if __name__ == "__main__":
    # Small shapes consistent with the module's forward: (batch, seq, d_model)
    batch, seq, d_model, d_inner = 2, 8, 32, 64

    key = jax.random.PRNGKey(0)
    kx, k1, k2, k3, k4 = jax.random.split(key, 5)

    x = jax.random.normal(kx, (batch, seq, d_model), dtype=jnp.float32)

    # PyTorch Linear stores W as (out, in); kept pre-transposed as (in, out)
    # here for row-major matmul on the MXU.
    w1 = 0.02 * jax.random.normal(k1, (d_model, d_inner), dtype=jnp.float32)
    b1 = 0.01 * jax.random.normal(k2, (d_inner,), dtype=jnp.float32)
    w2 = 0.02 * jax.random.normal(k3, (d_inner, d_model), dtype=jnp.float32)
    b2 = 0.01 * jax.random.normal(k4, (d_model,), dtype=jnp.float32)
    gamma = jnp.ones((d_model,), dtype=jnp.float32)
    beta = jnp.zeros((d_model,), dtype=jnp.float32)

    ref = _reference(x, w1, b1, w2, b2, gamma, beta)

    # Exact-precision path (f32 matmuls): matches the torch fp32 reference tightly.
    out_f32 = positionwise_ffn(x, w1, b1, w2, b2, gamma, beta,
                               matmul_dtype=jnp.float32)
    out_f32 = jax.block_until_ready(out_f32)
    assert out_f32.shape == (batch, seq, d_model)
    assert jnp.allclose(out_f32, ref, atol=1e-5, rtol=1e-5), "f32 path mismatch"

    # Production path (bf16 MXU operands, f32 accumulation / GELU / LayerNorm).
    out_bf16 = positionwise_ffn(x, w1, b1, w2, b2, gamma, beta)
    out_bf16 = jax.block_until_ready(out_bf16)
    assert out_bf16.shape == (batch, seq, d_model)
    assert jnp.allclose(out_bf16, ref, atol=3e-2, rtol=3e-2), "bf16 path mismatch"

    print("KERNEL_OK")
</pallas_src>

<mosaic_0001>
module attributes {stable_mosaic.version = 11 : i64} {
  func.func @_ffn_layernorm_kernel(%arg0: i32, %arg1: i32, %arg2: memref<16x32xf32, #tpu.memory_space<vmem>>, %arg3: memref<32x64xf32, #tpu.memory_space<vmem>>, %arg4: memref<1x64xf32, #tpu.memory_space<vmem>>, %arg5: memref<64x32xf32, #tpu.memory_space<vmem>>, %arg6: memref<1x32xf32, #tpu.memory_space<vmem>>, %arg7: memref<1x32xf32, #tpu.memory_space<vmem>>, %arg8: memref<1x32xf32, #tpu.memory_space<vmem>>, %arg9: memref<16x32xf32, #tpu.memory_space<vmem>>, %arg10: memref<16x32xf32, #tpu.memory_space<vmem>>) attributes {dimension_semantics = [#tpu.dimension_semantics<parallel>, #tpu.dimension_semantics<arbitrary>], iteration_bounds = array<i64: 1, 1>, scalar_prefetch = 0 : i64, scratch_operands = 1 : i64, tpu.core_type = #tpu.core_type<tc>, window_params = [{transform_indices = @transform_0, window_bounds = array<i64: 16, 32>}, {pipeline_mode = #tpu.pipeline_mode<synchronous>, transform_indices = @transform_1, window_bounds = array<i64: 32, 64>}, {pipeline_mode = #tpu.pipeline_mode<synchronous>, transform_indices = @transform_2, window_bounds = array<i64: 1, 64>}, {pipeline_mode = #tpu.pipeline_mode<synchronous>, transform_indices = @transform_3, window_bounds = array<i64: 64, 32>}, {pipeline_mode = #tpu.pipeline_mode<synchronous>, transform_indices = @transform_4, window_bounds = array<i64: 1, 32>}, {pipeline_mode = #tpu.pipeline_mode<synchronous>, transform_indices = @transform_5, window_bounds = array<i64: 1, 32>}, {pipeline_mode = #tpu.pipeline_mode<synchronous>, transform_indices = @transform_6, window_bounds = array<i64: 1, 32>}, {transform_indices = @transform_7, window_bounds = array<i64: 16, 32>}]} {
    %c0_i32 = arith.constant 0 : i32
    %0 = arith.cmpi eq, %arg1, %c0_i32 : i32
    %1 = arith.extui %0 : i1 to i32
    %c0_i32_0 = arith.constant 0 : i32
    %2 = arith.cmpi ne, %1, %c0_i32_0 : i32
    scf.if %2 {
      %cst_18 = arith.constant 0.000000e+00 : f32
      %25 = vector.broadcast %cst_18 : f32 to vector<16x32xf32>
      %c0_19 = arith.constant 0 : index
      %c0_20 = arith.constant 0 : index
      %26 = vector.load %arg10[%c0_19, %c0_20] : memref<16x32xf32, #tpu.memory_space<vmem>>, vector<16x32xf32>
      tpu.vector_store %arg10[%c0_19, %c0_20], %25 {strides = array<i32>} : memref<16x32xf32, #tpu.memory_space<vmem>>, vector<16x32xf32>,
    } else {
    }
    %c0 = arith.constant 0 : index
    %c0_1 = arith.constant 0 : index
    %3 = vector.load %arg2[%c0, %c0_1] : memref<16x32xf32, #tpu.memory_space<vmem>>, vector<16x32xf32>
    %c0_2 = arith.constant 0 : index
    %c0_3 = arith.constant 0 : index
    %4 = vector.load %arg3[%c0_2, %c0_3] : memref<32x64xf32, #tpu.memory_space<vmem>>, vector<32x64xf32>
    %cst = arith.constant dense<0.000000e+00> : vector<16x64xf32>
    %5 = tpu.matmul %3, %4, %cst {dimension_numbers = #tpu.dot_dimension_numbers<[1], [0], [0], [1], [0, 0, 1, 1], [], []>} : vector<16x32xf32>, vector<32x64xf32>, vector<16x64xf32> -> vector<16x64xf32>
    %c0_4 = arith.constant 0 : index
    %c0_5 = arith.constant 0 : index
    %6 = vector.load %arg4[%c0_4, %c0_5] : memref<1x64xf32, #tpu.memory_space<vmem>>, vector<1x64xf32>
    %7 = vector.broadcast %6 : vector<1x64xf32> to vector<16x64xf32>
    %8 = arith.addf %5, %7 : vector<16x64xf32>
    %cst_6 = arith.constant 5.000000e-01 : f32
    %9 = vector.broadcast %cst_6 : f32 to vector<16x64xf32>
    %10 = arith.mulf %9, %8 : vector<16x64xf32>
    %cst_7 = arith.constant 0.707106769 : f32
    %11 = vector.broadcast %cst_7 : f32 to vector<16x64xf32>
    %12 = arith.mulf %8, %11 : vector<16x64xf32>
    %13 = math.erf %12 : vector<16x64xf32>
    %cst_8 = arith.constant 1.000000e+00 : f32
    %14 = vector.broadcast %cst_8 : f32 to vector<16x64xf32>
    %15 = arith.addf %14, %13 : vector<16x64xf32>
    %16 = arith.mulf %10, %15 : vector<16x64xf32>
    %c0_9 = arith.constant 0 : index
    %c0_10 = arith.constant 0 : index
    %17 = vector.load %arg10[%c0_9, %c0_10] : memref<16x32xf32, #tpu.memory_space<vmem>>, vector<16x32xf32>
    %c0_11 = arith.constant 0 : index
    %c0_12 = arith.constant 0 : index
    %18 = vector.load %arg5[%c0_11, %c0_12] : memref<64x32xf32, #tpu.memory_space<vmem>>, vector<64x32xf32>
    %cst_13 = arith.constant dense<0.000000e+00> : vector<16x32xf32>
    %19 = tpu.matmul %16, %18, %cst_13 {dimension_numbers = #tpu.dot_dimension_numbers<[1], [0], [0], [1], [0, 0, 1, 1], [], []>} : vector<16x64xf32>, vector<64x32xf32>, vector<16x32xf32> -> vector<16x32xf32>
    %20 = arith.addf %17, %19 : vector<16x32xf32>
    %c0_14 = arith.constant 0 : index
    %c0_15 = arith.constant 0 : index
    %21 = vector.load %arg10[%c0_14, %c0_15] : memref<16x32xf32, #tpu.memory_space<vmem>>, vector<16x32xf32>
    tpu.vector_store %arg10[%c0_14, %c0_15], %20 {strides = array<i32>} : memref<16x32xf32, #tpu.memory_space<vmem>>, vector<16x32xf32>,
    %c0_i32_16 = arith.constant 0 : i32
    %22 = arith.cmpi eq, %arg1, %c0_i32_16 : i32
    %23 = arith.extui %22 : i1 to i32
    %c0_i32_17 = arith.constant 0 : i32
    %24 = arith.cmpi ne, %23, %c0_i32_17 : i32
    scf.if %24 {
      %c0_18 = arith.constant 0 : index
      %c0_19 = arith.constant 0 : index
      %25 = vector.load %arg10[%c0_18, %c0_19] : memref<16x32xf32, #tpu.memory_space<vmem>>, vector<16x32xf32>
      %c0_20 = arith.constant 0 : index
      %c0_21 = arith.constant 0 : index
      %26 = vector.load %arg6[%c0_20, %c0_21] : memref<1x32xf32, #tpu.memory_space<vmem>>, vector<1x32xf32>
      %27 = vector.broadcast %26 : vector<1x32xf32> to vector<16x32xf32>
      %28 = arith.addf %25, %27 : vector<16x32xf32>
      %29 = arith.addf %3, %28 : vector<16x32xf32>
      %cst_22 = arith.constant dense<0.000000e+00> : vector<16xf32>
      %30 = vector.multi_reduction <add>, %29, %cst_22 [1] : vector<16x32xf32> to vector<16xf32>
      %31 = vector.shape_cast %30 : vector<16xf32> to vector<16x1xf32>
      %cst_23 = arith.constant 3.200000e+01 : f32
      %32 = vector.broadcast %cst_23 : f32 to vector<16x1xf32>
      %33 = arith.divf %31, %32 : vector<16x1xf32>
      %34 = vector.broadcast %33 : vector<16x1xf32> to vector<16x32xf32>
      %35 = arith.subf %29, %34 : vector<16x32xf32>
      %36 = arith.mulf %35, %35 : vector<16x32xf32>
      %cst_24 = arith.constant dense<0.000000e+00> : vector<16xf32>
      %37 = vector.multi_reduction <add>, %36, %cst_24 [1] : vector<16x32xf32> to vector<16xf32>
      %38 = vector.shape_cast %37 : vector<16xf32> to vector<16x1xf32>
      %cst_25 = arith.constant 3.200000e+01 : f32
      %39 = vector.broadcast %cst_25 : f32 to vector<16x1xf32>
      %40 = arith.divf %38, %39 : vector<16x1xf32>
      %cst_26 = arith.constant 9.99999974E-6 : f32
      %41 = vector.broadcast %cst_26 : f32 to vector<16x1xf32>
      %42 = arith.addf %40, %41 : vector<16x1xf32>
      %43 = math.rsqrt %42 : vector<16x1xf32>
      %44 = vector.broadcast %43 : vector<16x1xf32> to vector<16x32xf32>
      %45 = arith.mulf %35, %44 : vector<16x32xf32>
      %c0_27 = arith.constant 0 : index
      %c0_28 = arith.constant 0 : index
      %46 = vector.load %arg7[%c0_27, %c0_28] : memref<1x32xf32, #tpu.memory_space<vmem>>, vector<1x32xf32>
      %47 = vector.broadcast %46 : vector<1x32xf32> to vector<16x32xf32>
      %48 = arith.mulf %45, %47 : vector<16x32xf32>
      %c0_29 = arith.constant 0 : index
      %c0_30 = arith.constant 0 : index
      %49 = vector.load %arg8[%c0_29, %c0_30] : memref<1x32xf32, #tpu.memory_space<vmem>>, vector<1x32xf32>
      %50 = vector.broadcast %49 : vector<1x32xf32> to vector<16x32xf32>
      %51 = arith.addf %48, %50 : vector<16x32xf32>
      %c0_31 = arith.constant 0 : index
      %c0_32 = arith.constant 0 : index
      %52 = vector.load %arg9[%c0_31, %c0_32] : memref<16x32xf32, #tpu.memory_space<vmem>>, vector<16x32xf32>
      tpu.vector_store %arg9[%c0_31, %c0_32], %51 {strides = array<i32>} : memref<16x32xf32, #tpu.memory_space<vmem>>, vector<16x32xf32>,
    } else {
    }
    return
  }
  func.func @transform_0(%arg0: i32, %arg1: i32) -> (i32, i32) {
    %c0_i32 = arith.constant 0 : i32
    %c0_i32_0 = arith.constant 0 : i32
    return %arg0, %c0_i32 : i32, i32
  }
  func.func @transform_1(%arg0: i32, %arg1: i32) -> (i32, i32) {
    %c0_i32 = arith.constant 0 : i32
    %c0_i32_0 = arith.constant 0 : i32
    %c0_i32_1 = arith.constant 0 : i32
    return %c0_i32, %c0_i32_0 : i32, i32
  }
  func.func @transform_2(%arg0: i32, %arg1: i32) -> (i32, i32) {
    %c0_i32 = arith.constant 0 : i32
    %c0_i32_0 = arith.constant 0 : i32
    %c0_i32_1 = arith.constant 0 : i32
    return %c0_i32, %c0_i32_0 : i32, i32
  }
  func.func @transform_3(%arg0: i32, %arg1: i32) -> (i32, i32) {
    %c0_i32 = arith.constant 0 : i32
    %c0_i32_0 = arith.constant 0 : i32
    %c0_i32_1 = arith.constant 0 : i32
    return %c0_i32, %c0_i32_0 : i32, i32
  }
  func.func @transform_4(%arg0: i32, %arg1: i32) -> (i32, i32) {
    %c0_i32 = arith.constant 0 : i32
    %c0_i32_0 = arith.constant 0 : i32
    %c0_i32_1 = arith.constant 0 : i32
    return %c0_i32, %c0_i32_0 : i32, i32
  }
  func.func @transform_5(%arg0: i32, %arg1: i32) -> (i32, i32) {
    %c0_i32 = arith.constant 0 : i32
    %c0_i32_0 = arith.constant 0 : i32
    %c0_i32_1 = arith.constant 0 : i32
    return %c0_i32, %c0_i32_0 : i32, i32
  }
  func.func @transform_6(%arg0: i32, %arg1: i32) -> (i32, i32) {
    %c0_i32 = arith.constant 0 : i32
    %c0_i32_0 = arith.constant 0 : i32
    %c0_i32_1 = arith.constant 0 : i32
    return %c0_i32, %c0_i32_0 : i32, i32
  }
  func.func @transform_7(%arg0: i32, %arg1: i32) -> (i32, i32) {
    %c0_i32 = arith.constant 0 : i32
    %c0_i32_0 = arith.constant 0 : i32
    return %arg0, %c0_i32 : i32, i32
  }
}

module attributes {stable_mosaic.version = 11 : i64} {
  func.func @_ffn_layernorm_kernel(%arg0: i32, %arg1: i32, %arg2: memref<16x32xf32, #tpu.memory_space<vmem>>, %arg3: memref<32x64xf32, #tpu.memory_space<vmem>>, %arg4: memref<1x64xf32, #tpu.memory_space<vmem>>, %arg5: memref<64x32xf32, #tpu.memory_space<vmem>>, %arg6: memref<1x32xf32, #tpu.memory_space<vmem>>, %arg7: memref<1x32xf32, #tpu.memory_space<vmem>>, %arg8: memref<1x32xf32, #tpu.memory_space<vmem>>, %arg9: memref<16x32xf32, #tpu.memory_space<vmem>>, %arg10: memref<16x32xf32, #tpu.memory_space<vmem>>) attributes {dimension_semantics = [#tpu.dimension_semantics<parallel>, #tpu.dimension_semantics<arbitrary>], iteration_bounds = array<i64: 1, 1>, scalar_prefetch = 0 : i64, scratch_operands = 1 : i64, tpu.core_type = #tpu.core_type<tc>, window_params = [{transform_indices = @transform_0, window_bounds = array<i64: 16, 32>}, {pipeline_mode = #tpu.pipeline_mode<synchronous>, transform_indices = @transform_1, window_bounds = array<i64: 32, 64>}, {pipeline_mode = #tpu.pipeline_mode<synchronous>, transform_indices = @transform_2, window_bounds = array<i64: 1, 64>}, {pipeline_mode = #tpu.pipeline_mode<synchronous>, transform_indices = @transform_3, window_bounds = array<i64: 64, 32>}, {pipeline_mode = #tpu.pipeline_mode<synchronous>, transform_indices = @transform_4, window_bounds = array<i64: 1, 32>}, {pipeline_mode = #tpu.pipeline_mode<synchronous>, transform_indices = @transform_5, window_bounds = array<i64: 1, 32>}, {pipeline_mode = #tpu.pipeline_mode<synchronous>, transform_indices = @transform_6, window_bounds = array<i64: 1, 32>}, {transform_indices = @transform_7, window_bounds = array<i64: 16, 32>}]} {
    %c0_i32 = arith.constant 0 : i32
    %0 = arith.cmpi eq, %arg1, %c0_i32 : i32
    %1 = arith.extui %0 : i1 to i32
    %c0_i32_0 = arith.constant 0 : i32
    %2 = arith.cmpi ne, %1, %c0_i32_0 : i32
    scf.if %2 {
      %cst_18 = arith.constant 0.000000e+00 : f32
      %25 = vector.broadcast %cst_18 : f32 to vector<16x32xf32>
      %c0_19 = arith.constant 0 : index
      %c0_20 = arith.constant 0 : index
      %26 = vector.load %arg10[%c0_19, %c0_20] : memref<16x32xf32, #tpu.memory_space<vmem>>, vector<16x32xf32>
      tpu.vector_store %arg10[%c0_19, %c0_20], %25 {strides = array<i32>} : memref<16x32xf32, #tpu.memory_space<vmem>>, vector<16x32xf32>,
    } else {
    }
    %c0 = arith.constant 0 : index
    %c0_1 = arith.constant 0 : index
    %3 = vector.load %arg2[%c0, %c0_1] : memref<16x32xf32, #tpu.memory_space<vmem>>, vector<16x32xf32>
    %c0_2 = arith.constant 0 : index
    %c0_3 = arith.constant 0 : index
    %4 = vector.load %arg3[%c0_2, %c0_3] : memref<32x64xf32, #tpu.memory_space<vmem>>, vector<32x64xf32>
    %cst = arith.constant dense<0.000000e+00> : vector<16x64xf32>
    %5 = tpu.matmul %3, %4, %cst {dimension_numbers = #tpu.dot_dimension_numbers<[1], [0], [0], [1], [0, 0, 1, 1], [], []>} : vector<16x32xf32>, vector<32x64xf32>, vector<16x64xf32> -> vector<16x64xf32>
    %c0_4 = arith.constant 0 : index
    %c0_5 = arith.constant 0 : index
    %6 = vector.load %arg4[%c0_4, %c0_5] : memref<1x64xf32, #tpu.memory_space<vmem>>, vector<1x64xf32>
    %7 = vector.broadcast %6 : vector<1x64xf32> to vector<16x64xf32>
    %8 = arith.addf %5, %7 : vector<16x64xf32>
    %cst_6 = arith.constant 5.000000e-01 : f32
    %9 = vector.broadcast %cst_6 : f32 to vector<16x64xf32>
    %10 = arith.mulf %9, %8 : vector<16x64xf32>
    %cst_7 = arith.constant 0.707106769 : f32
    %11 = vector.broadcast %cst_7 : f32 to vector<16x64xf32>
    %12 = arith.mulf %8, %11 : vector<16x64xf32>
    %13 = math.erf %12 : vector<16x64xf32>
    %cst_8 = arith.constant 1.000000e+00 : f32
    %14 = vector.broadcast %cst_8 : f32 to vector<16x64xf32>
    %15 = arith.addf %14, %13 : vector<16x64xf32>
    %16 = arith.mulf %10, %15 : vector<16x64xf32>
    %c0_9 = arith.constant 0 : index
    %c0_10 = arith.constant 0 : index
    %17 = vector.load %arg10[%c0_9, %c0_10] : memref<16x32xf32, #tpu.memory_space<vmem>>, vector<16x32xf32>
    %c0_11 = arith.constant 0 : index
    %c0_12 = arith.constant 0 : index
    %18 = vector.load %arg5[%c0_11, %c0_12] : memref<64x32xf32, #tpu.memory_space<vmem>>, vector<64x32xf32>
    %cst_13 = arith.constant dense<0.000000e+00> : vector<16x32xf32>
    %19 = tpu.matmul %16, %18, %cst_13 {dimension_numbers = #tpu.dot_dimension_numbers<[1], [0], [0], [1], [0, 0, 1, 1], [], []>} : vector<16x64xf32>, vector<64x32xf32>, vector<16x32xf32> -> vector<16x32xf32>
    %20 = arith.addf %17, %19 : vector<16x32xf32>
    %c0_14 = arith.constant 0 : index
    %c0_15 = arith.constant 0 : index
    %21 = vector.load %arg10[%c0_14, %c0_15] : memref<16x32xf32, #tpu.memory_space<vmem>>, vector<16x32xf32>
    tpu.vector_store %arg10[%c0_14, %c0_15], %20 {strides = array<i32>} : memref<16x32xf32, #tpu.memory_space<vmem>>, vector<16x32xf32>,
    %c0_i32_16 = arith.constant 0 : i32
    %22 = arith.cmpi eq, %arg1, %c0_i32_16 : i32
    %23 = arith.extui %22 : i1 to i32
    %c0_i32_17 = arith.constant 0 : i32
    %24 = arith.cmpi ne, %23, %c0_i32_17 : i32
    scf.if %24 {
      %c0_18 = arith.constant 0 : index
      %c0_19 = arith.constant 0 : index
      %25 = vector.load %arg10[%c0_18, %c0_19] : memref<16x32xf32, #tpu.memory_space<vmem>>, vector<16x32xf32>
      %c0_20 = arith.constant 0 : index
      %c0_21 = arith.constant 0 : index
      %26 = vector.load %arg6[%c0_20, %c0_21] : memref<1x32xf32, #tpu.memory_space<vmem>>, vector<1x32xf32>
      %27 = vector.broadcast %26 : vector<1x32xf32> to vector<16x32xf32>
      %28 = arith.addf %25, %27 : vector<16x32xf32>
      %29 = arith.addf %3, %28 : vector<16x32xf32>
      %cst_22 = arith.constant dense<0.000000e+00> : vector<16xf32>
      %30 = vector.multi_reduction <add>, %29, %cst_22 [1] : vector<16x32xf32> to vector<16xf32>
      %31 = vector.shape_cast %30 : vector<16xf32> to vector<16x1xf32>
      %cst_23 = arith.constant 3.200000e+01 : f32
      %32 = vector.broadcast %cst_23 : f32 to vector<16x1xf32>
      %33 = arith.divf %31, %32 : vector<16x1xf32>
      %34 = vector.broadcast %33 : vector<16x1xf32> to vector<16x32xf32>
      %35 = arith.subf %29, %34 : vector<16x32xf32>
      %36 = arith.mulf %35, %35 : vector<16x32xf32>
      %cst_24 = arith.constant dense<0.000000e+00> : vector<16xf32>
      %37 = vector.multi_reduction <add>, %36, %cst_24 [1] : vector<16x32xf32> to vector<16xf32>
      %38 = vector.shape_cast %37 : vector<16xf32> to vector<16x1xf32>
      %cst_25 = arith.constant 3.200000e+01 : f32
      %39 = vector.broadcast %cst_25 : f32 to vector<16x1xf32>
      %40 = arith.divf %38, %39 : vector<16x1xf32>
      %cst_26 = arith.constant 9.99999974E-6 : f32
      %41 = vector.broadcast %cst_26 : f32 to vector<16x1xf32>
      %42 = arith.addf %40, %41 : vector<16x1xf32>
      %43 = math.rsqrt %42 : vector<16x1xf32>
      %44 = vector.broadcast %43 : vector<16x1xf32> to vector<16x32xf32>
      %45 = arith.mulf %35, %44 : vector<16x32xf32>
      %c0_27 = arith.constant 0 : index
      %c0_28 = arith.constant 0 : index
      %46 = vector.load %arg7[%c0_27, %c0_28] : memref<1x32xf32, #tpu.memory_space<vmem>>, vector<1x32xf32>
      %47 = vector.broadcast %46 : vector<1x32xf32> to vector<16x32xf32>
      %48 = arith.mulf %45, %47 : vector<16x32xf32>
      %c0_29 = arith.constant 0 : index
      %c0_30 = arith.constant 0 : index
      %49 = vector.load %arg8[%c0_29, %c0_30] : memref<1x32xf32, #tpu.memory_space<vmem>>, vector<1x32xf32>
      %50 = vector.broadcast %49 : vector<1x32xf32> to vector<16x32xf32>
      %51 = arith.addf %48, %50 : vector<16x32xf32>
      %c0_31 = arith.constant 0 : index
      %c0_32 = arith.constant 0 : index
      %52 = vector.load %arg9[%c0_31, %c0_32] : memref<16x32xf32, #tpu.memory_space<vmem>>, vector<16x32xf32>
      tpu.vector_store %arg9[%c0_31, %c0_32], %51 {strides = array<i32>} : memref<16x32xf32, #tpu.memory_space<vmem>>, vector<16x32xf32>,
    } else {
    }
    return
  }
  func.func @transform_0(%arg0: i32, %arg1: i32) -> (i32, i32) {
    %c0_i32 = arith.constant 0 : i32
    %c0_i32_0 = arith.constant 0 : i32
    return %arg0, %c0_i32 : i32, i32
  }
  func.func @transform_1(%arg0: i32, %arg1: i32) -> (i32, i32) {
    %c0_i32 = arith.constant 0 : i32
    %c0_i32_0 = arith.constant 0 : i32
    %c0_i32_1 = arith.constant 0 : i32
    return %c0_i32, %c0_i32_0 : i32, i32
  }
  func.func @transform_2(%arg0: i32, %arg1: i32) -> (i32, i32) {
    %c0_i32 = arith.constant 0 : i32
    %c0_i32_0 = arith.constant 0 : i32
    %c0_i32_1 = arith.constant 0 : i32
    return %c0_i32, %c0_i32_0 : i32, i32
  }
  func.func @transform_3(%arg0: i32, %arg1: i32) -> (i32, i32) {
    %c0_i32 = arith.constant 0 : i32
    %c0_i32_0 = arith.constant 0 : i32
    %c0_i32_1 = arith.constant 0 : i32
    return %c0_i32, %c0_i32_0 : i32, i32
  }
  func.func @transform_4(%arg0: i32, %arg1: i32) -> (i32, i32) {
    %c0_i32 = arith.constant 0 : i32
    %c0_i32_0 = arith.constant 0 : i32
    %c0_i32_1 = arith.constant 0 : i32
    return %c0_i32, %c0_i32_0 : i32, i32
  }
  func.func @transform_5(%arg0: i32, %arg1: i32) -> (i32, i32) {
    %c0_i32 = arith.constant 0 : i32
    %c0_i32_0 = arith.constant 0 : i32
    %c0_i32_1 = arith.constant 0 : i32
    return %c0_i32, %c0_i32_0 : i32, i32
  }
  func.func @transform_6(%arg0: i32, %arg1: i32) -> (i32, i32) {
    %c0_i32 = arith.constant 0 : i32
    %c0_i32_0 = arith.constant 0 : i32
    %c0_i32_1 = arith.constant 0 : i32
    return %c0_i32, %c0_i32_0 : i32, i32
  }
  func.func @transform_7(%arg0: i32, %arg1: i32) -> (i32, i32) {
    %c0_i32 = arith.constant 0 : i32
    %c0_i32_0 = arith.constant 0 : i32
    return %arg0, %c0_i32 : i32, i32
  }
}

</mosaic_0001>

<bundles_post_ra>
// kernel: tpu_custom_call.1
= control target key start
LH: loop header
LB: loop body
LE: loop exit
PB: predicated region body
PF: predicated region fallthrough
CT: control target
= control target key end

     0   :  { %vm31_vm0 = vcmask 261120   ;;  %s523_s0 = inlined_call_operand.vmem [shape: f32[16,32], index: 0, kind: input, shape index: {}]   ;;  %s524_s1 = inlined_call_operand.vmem [shape: f32[32,64], index: 1, kind: input, shape index: {}]   ;;  %s525_s2 = inlined_call_operand.vmem [shape: f32[1,64], index: 2, kind: input, shape index: {}]   ;;  %s526_s3 = inlined_call_operand.vmem [shape: f32[64,32], index: 3, kind: input, shape index: {}]   ;;  %s527_s4 = inlined_call_operand.vmem [shape: f32[1,32], index: 4, kind: input, shape index: {}]   ;;  %s528_s5 = inlined_call_operand.vmem [shape: f32[1,32], index: 5, kind: input, shape index: {}]   ;;  %s529_s6 = inlined_call_operand.vmem [shape: f32[1,32], index: 6, kind: input, shape index: {}]   ;;  %s530_s7 = inlined_call_operand.hbm [shape: f32[16,32], index: 7, kind: output, shape index: {}]  }
   0x1   :  { %v39_v0 = vld [vmem:[%s524_s1 + $0x18] sm:$0xff]  ;;  %v38_v1 = vld [vmem:[%s524_s1 + $0x10] sm:$0xff]  ;;  %v455_v2 = vld [vmem:[%s523_s0] sm:$0xff] }
   0x2   :  { %338 = vmatprep.subr.mxu0 %v39_v0  ;;  %v37_v3 = vld [vmem:[%s524_s1 + $0x8] sm:$0xff]  ;;  %346 = vmatprep.mubr.msk.f32.mxu0 %vm31_vm0, %v455_v2 }
   0x3   :  { %339 = vmatpush3.msra.mxu0 %v39_v0 }
   0x4   :  { %12 = vsyncpa [#allocation4], 0  ;;  %340 = vmatprep.subr.mxu0 %v38_v1  ;;  %v36_v4 = vld [vmem:[%s524_s1] sm:$0xff]  ;;  %v468_v5 = vld [vmem:[%s523_s0 + $0x8] sm:$0xff]  ;;  %v402_v14 = vmov 0.0   ;;  %vm149_vm1 = vcmask 523264  }
   0x5   :  { %341 = vmatpush3.msra.mxu0 %v38_v1  ;;  %v148_v6 = vld [vmem:[%s526_s3 + $0x38] sm:$0xff]  ;;  %v147_v7 = vld [vmem:[%s526_s3 + $0x30] sm:$0xff]  ;;  %v146_v8 = vld [vmem:[%s526_s3 + $0x28] sm:$0xff]  ;;  %33 = vst.msk [vmem:[#allocation2 + $0x8] sm:$0xff] %vm31_vm0, %v402_v14  ;;  %s403_s9 = smov [#allocation3]  }
   0x6   :  { %342 = vmatprep.subr.mxu0 %v37_v3  ;;  %349 = vmatprep.subr.mxu1 %v148_v6  ;;  %v145_v9 = vld [vmem:[%s526_s3 + $0x20] sm:$0xff]  ;;  %v144_v10 = vld [vmem:[%s526_s3 + $0x18] sm:$0xff]  ;;  %v143_v11 = vld [vmem:[%s526_s3 + $0x10] sm:$0xff]  ;;  %32 = vst.msk [vmem:[#allocation2] sm:$0xff] %vm31_vm0, %v402_v14  ;;  %s303_s10 = sshll.u32 %s403_s9, 4  ;;  %s304_s10 = int_to_ptr.vmem [resolvable:$true] %s303_s10 }
   0x7   :  { %343 = vmatpush3.msra.mxu0 %v37_v3  ;;  %350 = vmatpush3.msra.mxu1 %v148_v6  ;;  %v142_v12 = vld [vmem:[%s526_s3 + $0x8] sm:$0xff]  ;;  %v141_v13 = vld [vmem:[%s526_s3] sm:$0xff]  ;;  %s380_s11 = scalar_lea.vmem %s304_s10, 256  ;;  %p385_p1 = scmp.lt.s32.totalorder %s304_s10, %s304_s10 }
   0x8   :  { %344 = vmatprep.subr.mxu0 %v36_v4  ;;  %351 = vmatprep.subr.mxu1 %v147_v7  ;;  %v314_v15 = vld [vmem:[%s525_s2] ss:$0 sm:$0xff]  ;;  %p381_p0 = scmp.ne.s32.totalorder %s304_s10, %s380_s11  ;;  %p386_p2 = scmp.lt.s32.totalorder %s380_s11, %s380_s11 }
   0x9   :  { %345 = vmatpush3.msra.mxu0 %v36_v4  ;;  %352 = vmatpush3.msra.mxu1 %v147_v7  ;;  %v319_v36 = vld [vmem:[%s527_s4] ss:$0 sm:$0xff] }
   0xa   :  { %347 = vmatmul.mubr.msk.f32.vlgmr.msra.gmra.mxu0 %vm31_vm0, %v468_v5  ;;  %353 = vmatprep.subr.mxu1 %v146_v8  ;;  %v320_v62 = vld [vmem:[%s528_s5] ss:$0 sm:$0xff]  ;;  %p387_p3 = por %p386_p2, %p385_p1 }
   0xb   :  { %354 = vmatpush3.msra.mxu1 %v146_v8  ;;  %v321_v0 = vld [vmem:[%s529_s6] ss:$0 sm:$0xff] }
   0xc   :  { %355 = vmatprep.subr.mxu1 %v145_v9  ;;  %v140_v30 = vld [vmem:[#allocation2 + $0x8] sm:$0xff]  ;;  %p388_p4 = pnand %p387_p3, %p381_p0 }
   0xd   :  { %356 = vmatpush3.msra.mxu1 %v145_v9  ;;  %v139_v32 = vld [vmem:[#allocation2] sm:$0xff] }
   0xe   :  { %357 = vmatprep.subr.mxu1 %v144_v10 }
   0xf   :  { %358 = vmatpush3.msra.mxu1 %v144_v10 }
  0x10   :  { %359 = vmatprep.subr.mxu1 %v143_v11 }
  0x11   :  { %360 = vmatpush3.msra.mxu1 %v143_v11 }
  0x12   :  { %361 = vmatprep.subr.mxu1 %v142_v12 }
  0x13   :  { %362 = vmatpush3.msra.mxu1 %v142_v12 }
  0x14   :  { %363 = vmatprep.subr.mxu1 %v141_v13 }
  0x15   :  { %364 = vmatpush3.msra.mxu1 %v141_v13 }
  0xca   :  { %v348_v16 = vpop.f32.mrf.mxu0 }
  0xcb   :  { %v126_v17 = vadd.f32 %v348_v16, %v314_v15 }
  0xcc   :  { %v120_v18 = vpop.f32.mrf.mxu0 }
  0xcd   :  { %v132_v19 = vmul.f32 0.70710677, %v126_v17  ;;  %v121_v20 = vadd.f32 %v314_v15, %v120_v18  ;;  %v130_v27 = vmul.f32 0.5, %v126_v17 }
  0xcf   :  { %372 = verf.f32 %v132_v19  ;;  %v131_v21 = vmul.f32 0.70710677, %v121_v20  ;;  %v129_v25 = vmul.f32 0.5, %v121_v20 }
  0xd1   :  { %374 = verf.f32 %v131_v21 }
  0xdc   :  { %v373_v22 = vpop.eup %372 }
  0xdd   :  { %v136_v24 = vadd.f32 1.0, %v373_v22 }
  0xde   :  { %v375_v23 = vpop.eup %374 }
  0xdf   :  { %v135_v26 = vadd.f32 1.0, %v375_v23  ;;  %v138_v29 = vmul.f32 %v136_v24, %v130_v27 }
  0xe1   :  { %v137_v28 = vmul.f32 %v135_v26, %v129_v25 }
  0xe3   :  { %365 = vmatprep.mubr.msk.f32.mxu1 %vm149_vm1, %v137_v28 }
  0xe4   :  { %366 = vmatmul.mubr.msk.f32.vlgmr.msra.gmra.mxu1 %vm149_vm1, %v138_v29 }
 0x1a4   :  { %v367_v31 = vpop.f32.mrf.mxu1 }
 0x1a5   :  { %v232_v33 = vadd.f32 %v367_v31, %v140_v30 }
 0x1a6   :  { %v222_v34 = vpop.f32.mrf.mxu1 }
 0x1a7   :  { %234 = vst.msk [vmem:[#allocation2 + $0x8] sm:$0xff] %vm31_vm0, %v232_v33  ;;  %v231_v35 = vadd.f32 %v222_v34, %v139_v32 }
 0x1a9   :  { %233 = vst.msk [vmem:[#allocation2] sm:$0xff] %vm31_vm0, %v231_v35 }
 0x1ae   :  { %v239_v37 = vld [vmem:[#allocation2 + $0x8] sm:$0xff] }
 0x1af   :  { %v248_v40 = vadd.f32 %v319_v36, %v239_v37 }
 0x1b0   :  { %v238_v38 = vld [vmem:[#allocation2] sm:$0xff] }
 0x1b1   :  { %v247_v39 = vadd.f32 %v319_v36, %v238_v38  ;;  %v250_v43 = vadd.f32 %v248_v40, %v468_v5 }
 0x1b3   :  { %v249_v41 = vadd.f32 %v247_v39, %v455_v2  ;;  %v254_v44 = vsel %vm31_vm0, %v250_v43, 0.0 }
 0x1b5   :  { %v251_v42 = vsel %vm31_vm0, %v249_v41, 0.0 }
 0x1b6   :  { %252 = vadd.xlane.f32.xlu0 %v251_v42 }
 0x1ba   :  { %255 = vadd.xlane.f32.xlu0 %v254_v44 }
 0x23f   :  { %v253_v45 = vpop.xlane.xlu0 %252 }
 0x240   :  { %v258_v46 = vmul.f32 0.03125, %v253_v45 }
 0x242   :  { %v260_v47 = vsub.f32 %v249_v41, %v258_v46 }
 0x243   :  { %v256_v48 = vpop.xlane.xlu0 %255 }
 0x244   :  { %v259_v49 = vmul.f32 0.03125, %v256_v48  ;;  %v262_v50 = vmul.f32 %v260_v47, %v260_v47 }
 0x246   :  { %v261_v51 = vsub.f32 %v250_v43, %v259_v49  ;;  %v264_v52 = vsel %vm31_vm0, %v262_v50, 0.0 }
 0x247   :  { %265 = vadd.xlane.f32.xlu1 %v264_v52 }
 0x248   :  { %v263_v53 = vmul.f32 %v261_v51, %v261_v51 }
 0x24a   :  { %v267_v54 = vsel %vm31_vm0, %v263_v53, 0.0 }
 0x24b   :  { %268 = vadd.xlane.f32.xlu1 %v267_v54 }
 0x2d0   :  { %v266_v55 = vpop.xlane.xlu1 %265 }
 0x2d1   :  { %v270_v56 = vmul.f32 0.03125, %v266_v55 }
 0x2d3   :  { %v272_v57 = vadd.f32 1e-05, %v270_v56 }
 0x2d4   :  { %v269_v58 = vpop.xlane.xlu1 %268 }
 0x2d5   :  { %376 = vrsqrt.f32 %v272_v57  ;;  %v271_v59 = vmul.f32 0.03125, %v269_v58 }
 0x2d7   :  { %v273_v60 = vadd.f32 1e-05, %v271_v59 }
 0x2d9   :  { %378 = vrsqrt.f32 %v273_v60 }
 0x2e2   :  { %v377_v61 = vpop.eup %376 }
 0x2e3   :  { %v276_v63 = vmul.f32 %v377_v61, %v260_v47 }
 0x2e5   :  { %v285_v1 = vmul.f32 %v320_v62, %v276_v63 }
 0x2e6   :  { %v379_v2 = vpop.eup %378 }
 0x2e7   :  { %v277_v3 = vmul.f32 %v379_v2, %v261_v51  ;;  %v294_v4 = vadd.f32 %v321_v0, %v285_v1 }
 0x2e9   :  { %v286_v5 = vmul.f32 %v320_v62, %v277_v3  ;;  %296 = vst.msk [vmem:[#allocation3] sm:$0xff] %vm31_vm0, %v294_v4 }
 0x2eb   :  { %v295_v6 = vadd.f32 %v321_v0, %v286_v5 }
 0x2ed   :  { %297 = vst.msk [vmem:[#allocation3 + $0x8] sm:$0xff] %vm31_vm0, %v295_v6 }
 0x2ee   :  { %391 = shalt.err (!%p388_p4)
}
 0x2ef   :  { %s404_s5 = smov 128   ;;  %s405_s6 = smov 8  }
 0x2f0   :  { %309 = dma.vmem_to_hbm [thread:$0]  %s304_s10, 256, %s530_s7, [#allocation4], %s404_s5, %s404_s5, %s405_s6  }
 0x2f1   :  { %400 = dma.done.wait [#allocation4], 256  }
 0x2f2   :  { %401 = vsyncadd [#allocation4], 4294967040 }
 0x2f3   :  { %313 = vsyncpa [#allocation4], 1 }

// kernel: tpu_custom_call.1
= control target key start
LH: loop header
LB: loop body
LE: loop exit
PB: predicated region body
PF: predicated region fallthrough
CT: control target
= control target key end

     0   :  { %vm31_vm0 = vcmask 261120   ;;  %s523_s0 = inlined_call_operand.vmem [shape: f32[16,32], index: 0, kind: input, shape index: {}]   ;;  %s524_s1 = inlined_call_operand.vmem [shape: f32[32,64], index: 1, kind: input, shape index: {}]   ;;  %s525_s2 = inlined_call_operand.vmem [shape: f32[1,64], index: 2, kind: input, shape index: {}]   ;;  %s526_s3 = inlined_call_operand.vmem [shape: f32[64,32], index: 3, kind: input, shape index: {}]   ;;  %s527_s4 = inlined_call_operand.vmem [shape: f32[1,32], index: 4, kind: input, shape index: {}]   ;;  %s528_s5 = inlined_call_operand.vmem [shape: f32[1,32], index: 5, kind: input, shape index: {}]   ;;  %s529_s6 = inlined_call_operand.vmem [shape: f32[1,32], index: 6, kind: input, shape index: {}]   ;;  %s530_s7 = inlined_call_operand.hbm [shape: f32[16,32], index: 7, kind: output, shape index: {}]  }
   0x1   :  { %v39_v0 = vld [vmem:[%s524_s1 + $0x18] sm:$0xff]  ;;  %v38_v1 = vld [vmem:[%s524_s1 + $0x10] sm:$0xff]  ;;  %v455_v2 = vld [vmem:[%s523_s0] sm:$0xff] }
   0x2   :  { %338 = vmatprep.subr.mxu0 %v39_v0  ;;  %v37_v3 = vld [vmem:[%s524_s1 + $0x8] sm:$0xff]  ;;  %346 = vmatprep.mubr.msk.f32.mxu0 %vm31_vm0, %v455_v2 }
   0x3   :  { %339 = vmatpush3.msra.mxu0 %v39_v0 }
   0x4   :  { %12 = vsyncpa [#allocation4], 0  ;;  %340 = vmatprep.subr.mxu0 %v38_v1  ;;  %v36_v4 = vld [vmem:[%s524_s1] sm:$0xff]  ;;  %v468_v5 = vld [vmem:[%s523_s0 + $0x8] sm:$0xff]  ;;  %v402_v14 = vmov 0.0   ;;  %vm149_vm1 = vcmask 523264  }
   0x5   :  { %341 = vmatpush3.msra.mxu0 %v38_v1  ;;  %v148_v6 = vld [vmem:[%s526_s3 + $0x38] sm:$0xff]  ;;  %v147_v7 = vld [vmem:[%s526_s3 + $0x30] sm:$0xff]  ;;  %v146_v8 = vld [vmem:[%s526_s3 + $0x28] sm:$0xff]  ;;  %33 = vst.msk [vmem:[#allocation2 + $0x8] sm:$0xff] %vm31_vm0, %v402_v14  ;;  %s403_s9 = smov [#allocation3]  }
   0x6   :  { %342 = vmatprep.subr.mxu0 %v37_v3  ;;  %349 = vmatprep.subr.mxu1 %v148_v6  ;;  %v145_v9 = vld [vmem:[%s526_s3 + $0x20] sm:$0xff]  ;;  %v144_v10 = vld [vmem:[%s526_s3 + $0x18] sm:$0xff]  ;;  %v143_v11 = vld [vmem:[%s526_s3 + $0x10] sm:$0xff]  ;;  %32 = vst.msk [vmem:[#allocation2] sm:$0xff] %vm31_vm0, %v402_v14  ;;  %s303_s10 = sshll.u32 %s403_s9, 4  ;;  %s304_s10 = int_to_ptr.vmem [resolvable:$true] %s303_s10 }
   0x7   :  { %343 = vmatpush3.msra.mxu0 %v37_v3  ;;  %350 = vmatpush3.msra.mxu1 %v148_v6  ;;  %v142_v12 = vld [vmem:[%s526_s3 + $0x8] sm:$0xff]  ;;  %v141_v13 = vld [vmem:[%s526_s3] sm:$0xff]  ;;  %s380_s11 = scalar_lea.vmem %s304_s10, 256  ;;  %p385_p1 = scmp.lt.s32.totalorder %s304_s10, %s304_s10 }
   0x8   :  { %344 = vmatprep.subr.mxu0 %v36_v4  ;;  %351 = vmatprep.subr.mxu1 %v147_v7  ;;  %v314_v15 = vld [vmem:[%s525_s2] ss:$0 sm:$0xff]  ;;  %p381_p0 = scmp.ne.s32.totalorder %s304_s10, %s380_s11  ;;  %p386_p2 = scmp.lt.s32.totalorder %s380_s11, %s380_s11 }
   0x9   :  { %345 = vmatpush3.msra.mxu0 %v36_v4  ;;  %352 = vmatpush3.msra.mxu1 %v147_v7  ;;  %v319_v36 = vld [vmem:[%s527_s4] ss:$0 sm:$0xff] }
   0xa   :  { %347 = vmatmul.mubr.msk.f32.vlgmr.msra.gmra.mxu0 %vm31_vm0, %v468_v5  ;;  %353 = vmatprep.subr.mxu1 %v146_v8  ;;  %v320_v62 = vld [vmem:[%s528_s5] ss:$0 sm:$0xff]  ;;  %p387_p3 = por %p386_p2, %p385_p1 }
   0xb   :  { %354 = vmatpush3.msra.mxu1 %v146_v8  ;;  %v321_v0 = vld [vmem:[%s529_s6] ss:$0 sm:$0xff] }
   0xc   :  { %355 = vmatprep.subr.mxu1 %v145_v9  ;;  %v140_v30 = vld [vmem:[#allocation2 + $0x8] sm:$0xff]  ;;  %p388_p4 = pnand %p387_p3, %p381_p0 }
   0xd   :  { %356 = vmatpush3.msra.mxu1 %v145_v9  ;;  %v139_v32 = vld [vmem:[#allocation2] sm:$0xff] }
   0xe   :  { %357 = vmatprep.subr.mxu1 %v144_v10 }
   0xf   :  { %358 = vmatpush3.msra.mxu1 %v144_v10 }
  0x10   :  { %359 = vmatprep.subr.mxu1 %v143_v11 }
  0x11   :  { %360 = vmatpush3.msra.mxu1 %v143_v11 }
  0x12   :  { %361 = vmatprep.subr.mxu1 %v142_v12 }
  0x13   :  { %362 = vmatpush3.msra.mxu1 %v142_v12 }
  0x14   :  { %363 = vmatprep.subr.mxu1 %v141_v13 }
  0x15   :  { %364 = vmatpush3.msra.mxu1 %v141_v13 }
  0xca   :  { %v348_v16 = vpop.f32.mrf.mxu0 }
  0xcb   :  { %v126_v17 = vadd.f32 %v348_v16, %v314_v15 }
  0xcc   :  { %v120_v18 = vpop.f32.mrf.mxu0 }
  0xcd   :  { %v132_v19 = vmul.f32 0.70710677, %v126_v17  ;;  %v121_v20 = vadd.f32 %v314_v15, %v120_v18  ;;  %v130_v27 = vmul.f32 0.5, %v126_v17 }
  0xcf   :  { %372 = verf.f32 %v132_v19  ;;  %v131_v21 = vmul.f32 0.70710677, %v121_v20  ;;  %v129_v25 = vmul.f32 0.5, %v121_v20 }
  0xd1   :  { %374 = verf.f32 %v131_v21 }
  0xdc   :  { %v373_v22 = vpop.eup %372 }
  0xdd   :  { %v136_v24 = vadd.f32 1.0, %v373_v22 }
  0xde   :  { %v375_v23 = vpop.eup %374 }
  0xdf   :  { %v135_v26 = vadd.f32 1.0, %v375_v23  ;;  %v138_v29 = vmul.f32 %v136_v24, %v130_v27 }
  0xe1   :  { %v137_v28 = vmul.f32 %v135_v26, %v129_v25 }
  0xe3   :  { %365 = vmatprep.mubr.msk.f32.mxu1 %vm149_vm1, %v137_v28 }
  0xe4   :  { %366 = vmatmul.mubr.msk.f32.vlgmr.msra.gmra.mxu1 %vm149_vm1, %v138_v29 }
 0x1a4   :  { %v367_v31 = vpop.f32.mrf.mxu1 }
 0x1a5   :  { %v232_v33 = vadd.f32 %v367_v31, %v140_v30 }
 0x1a6   :  { %v222_v34 = vpop.f32.mrf.mxu1 }
 0x1a7   :  { %234 = vst.msk [vmem:[#allocation2 + $0x8] sm:$0xff] %vm31_vm0, %v232_v33  ;;  %v231_v35 = vadd.f32 %v222_v34, %v139_v32 }
 0x1a9   :  { %233 = vst.msk [vmem:[#allocation2] sm:$0xff] %vm31_vm0, %v231_v35 }
 0x1ae   :  { %v239_v37 = vld [vmem:[#allocation2 + $0x8] sm:$0xff] }
 0x1af   :  { %v248_v40 = vadd.f32 %v319_v36, %v239_v37 }
 0x1b0   :  { %v238_v38 = vld [vmem:[#allocation2] sm:$0xff] }
 0x1b1   :  { %v247_v39 = vadd.f32 %v319_v36, %v238_v38  ;;  %v250_v43 = vadd.f32 %v248_v40, %v468_v5 }
 0x1b3   :  { %v249_v41 = vadd.f32 %v247_v39, %v455_v2  ;;  %v254_v44 = vsel %vm31_vm0, %v250_v43, 0.0 }
 0x1b5   :  { %v251_v42 = vsel %vm31_vm0, %v249_v41, 0.0 }
 0x1b6   :  { %252 = vadd.xlane.f32.xlu0 %v251_v42 }
 0x1ba   :  { %255 = vadd.xlane.f32.xlu0 %v254_v44 }
 0x23f   :  { %v253_v45 = vpop.xlane.xlu0 %252 }
 0x240   :  { %v258_v46 = vmul.f32 0.03125, %v253_v45 }
 0x242   :  { %v260_v47 = vsub.f32 %v249_v41, %v258_v46 }
 0x243   :  { %v256_v48 = vpop.xlane.xlu0 %255 }
 0x244   :  { %v259_v49 = vmul.f32 0.03125, %v256_v48  ;;  %v262_v50 = vmul.f32 %v260_v47, %v260_v47 }
 0x246   :  { %v261_v51 = vsub.f32 %v250_v43, %v259_v49  ;;  %v264_v52 = vsel %vm31_vm0, %v262_v50, 0.0 }
 0x247   :  { %265 = vadd.xlane.f32.xlu1 %v264_v52 }
 0x248   :  { %v263_v53 = vmul.f32 %v261_v51, %v261_v51 }
 0x24a   :  { %v267_v54 = vsel %vm31_vm0, %v263_v53, 0.0 }
 0x24b   :  { %268 = vadd.xlane.f32.xlu1 %v267_v54 }
 0x2d0   :  { %v266_v55 = vpop.xlane.xlu1 %265 }
 0x2d1   :  { %v270_v56 = vmul.f32 0.03125, %v266_v55 }
 0x2d3   :  { %v272_v57 = vadd.f32 1e-05, %v270_v56 }
 0x2d4   :  { %v269_v58 = vpop.xlane.xlu1 %268 }
 0x2d5   :  { %376 = vrsqrt.f32 %v272_v57  ;;  %v271_v59 = vmul.f32 0.03125, %v269_v58 }
 0x2d7   :  { %v273_v60 = vadd.f32 1e-05, %v271_v59 }
 0x2d9   :  { %378 = vrsqrt.f32 %v273_v60 }
 0x2e2   :  { %v377_v61 = vpop.eup %376 }
 0x2e3   :  { %v276_v63 = vmul.f32 %v377_v61, %v260_v47 }
 0x2e5   :  { %v285_v1 = vmul.f32 %v320_v62, %v276_v63 }
 0x2e6   :  { %v379_v2 = vpop.eup %378 }
 0x2e7   :  { %v277_v3 = vmul.f32 %v379_v2, %v261_v51  ;;  %v294_v4 = vadd.f32 %v321_v0, %v285_v1 }
 0x2e9   :  { %v286_v5 = vmul.f32 %v320_v62, %v277_v3  ;;  %296 = vst.msk [vmem:[#allocation3] sm:$0xff] %vm31_vm0, %v294_v4 }
 0x2eb   :  { %v295_v6 = vadd.f32 %v321_v0, %v286_v5 }
 0x2ed   :  { %297 = vst.msk [vmem:[#allocation3 + $0x8] sm:$0xff] %vm31_vm0, %v295_v6 }
 0x2ee   :  { %391 = shalt.err (!%p388_p4)
}
 0x2ef   :  { %s404_s5 = smov 128   ;;  %s405_s6 = smov 8  }
 0x2f0   :  { %309 = dma.vmem_to_hbm [thread:$0]  %s304_s10, 256, %s530_s7, [#allocation4], %s404_s5, %s404_s5, %s405_s6  }
 0x2f1   :  { %400 = dma.done.wait [#allocation4], 256  }
 0x2f2   :  { %401 = vsyncadd [#allocation4], 4294967040 }
 0x2f3   :  { %313 = vsyncpa [#allocation4], 1 }

</bundles_post_ra>
